<compile_context>
chip_gen: v6e
topology: v6e:2x2x1
jax: 0.10.0
libtpu: 0.0.40
codegen_flags: <defaults>
</compile_context>

<pallas_src>
import functools

import jax
import jax.numpy as jnp
from jax.experimental import pallas as pl
from jax.experimental.pallas import tpu as pltpu

BN_EPS = 1e-5
DROPOUT_P = 0.5
LANE = 128
SUBLANE = 8


def _round_up(n, m):
    return ((n + m - 1) // m) * m


def _i32(v):
    """int32 constant with the bit pattern of a uint32 literal."""
    return jnp.int32(v - (1 << 32) if v >= (1 << 31) else v)


def _dropout_keep_bits(seed, shape):
    """splitmix32-style hash of (seed, flat element index) -> int32 uniform in [0, 2**31)."""
    rows = jax.lax.broadcasted_iota(jnp.int32, shape, 0)
    cols = jax.lax.broadcasted_iota(jnp.int32, shape, 1)
    x = rows * jnp.int32(shape[1]) + cols
    x = x + seed * _i32(0x9E3779B1)
    x = x ^ jax.lax.shift_right_logical(x, 16)
    x = x * _i32(0x7FEB352D)
    x = x ^ jax.lax.shift_right_logical(x, 15)
    x = x * _i32(0x846CA68B)
    x = x ^ jax.lax.shift_right_logical(x, 16)
    return jax.lax.shift_right_logical(x, 1)          # non-negative, top 31 bits uniform


def _mlp_bn_drop_body(x_ref, w1_ref, gb_ref, w2_ref, o_ref, *, batch, feature,
                      seed_ref=None):
    # x:  (Bp, F)            w1: (F, F_pad)          gb: (2, F_pad) = [gamma; beta]
    # w2: (F_pad, N_pad)  (row `feature` holds b2)   o:  (Bp, N_pad)
    x = x_ref[...]

    # ---- fc1 (bias omitted: a per-feature constant cancels exactly through
    #      training-mode BatchNorm, which subtracts the per-feature batch mean) ----
    h = jnp.dot(x, w1_ref[...], preferred_element_type=jnp.float32)     # (Bp, F_pad)

    # ---- BatchNorm1d, training mode, single pass (sum & sum-of-squares).
    #      Padded batch rows (if any) are all-zero and contribute 0 to both sums;
    #      we divide by the true batch size. ----
    inv_b = jnp.float32(1.0 / batch)
    s1 = jnp.sum(h, axis=0, keepdims=True)                              # (1, F_pad)
    s2 = jnp.sum(h * h, axis=0, keepdims=True)                          # (1, F_pad)
    mean = s1 * inv_b
    var = jnp.maximum(s2 * inv_b - mean * mean, 0.0)                    # biased batch var

    gb = gb_ref[...]
    scale = gb[0:1, :] * jax.lax.rsqrt(var + BN_EPS)                    # gamma/sqrt(var+eps)
    shift = gb[1:2, :] - mean * scale                                   # beta - mean*scale

    # ---- BN + ReLU fused ----
    h = jnp.maximum(h * scale + shift, 0.0)

    # ---- fold fc2 bias into the matmul: column `feature` of h is zero padding; set it
    #      to 1.0 so row `feature` of w2 (which stores b2) adds the bias via the MXU ----
    col = jax.lax.broadcasted_iota(jnp.int32, h.shape, 1)
    h = jnp.where(col == feature, 1.0, h)

    # ---- fc2 (bias included via the folded row) ----
    logits = jnp.dot(h, w2_ref[...], preferred_element_type=jnp.float32)  # (Bp, N_pad)

    # ---- dropout (p=0.5), only in the train variant ----
    if seed_ref is not None:
        bits = _dropout_keep_bits(seed_ref[0], logits.shape)
        keep = bits >= jnp.int32(int(DROPOUT_P * (1 << 31)))
        logits = jnp.where(keep, logits * (1.0 / (1.0 - DROPOUT_P)), 0.0)

    o_ref[...] = logits.astype(o_ref.dtype)


def _eval_kernel(x_ref, w1_ref, gb_ref, w2_ref, o_ref, *, batch, feature):
    _mlp_bn_drop_body(x_ref, w1_ref, gb_ref, w2_ref, o_ref,
                      batch=batch, feature=feature, seed_ref=None)


def _train_kernel(seed_ref, x_ref, w1_ref, gb_ref, w2_ref, o_ref, *, batch, feature):
    _mlp_bn_drop_body(x_ref, w1_ref, gb_ref, w2_ref, o_ref,
                      batch=batch, feature=feature, seed_ref=seed_ref)


def init_params(key, feature_size, distortion_type_len, distortion_level_len):
    """Raw (unpadded) params mimicking PyTorch defaults; weights stored as [in, out]."""
    F = feature_size
    N = distortion_level_len * distortion_type_len
    k1, k2, k3, k4 = jax.random.split(key, 4)
    bound = 1.0 / jnp.sqrt(float(F))
    return {
        "w1": jax.random.uniform(k1, (F, F), jnp.float32, -bound, bound),
        "b1": jax.random.uniform(k2, (F,), jnp.float32, -bound, bound),
        "gamma": jnp.ones((F,), jnp.float32),    # BatchNorm1d weight
        "beta": jnp.zeros((F,), jnp.float32),    # BatchNorm1d bias
        "w2": jax.random.uniform(k3, (F, N), jnp.float32, -bound, bound),
        "b2": jax.random.uniform(k4, (N,), jnp.float32, -bound, bound),
    }


def pack_params(raw, feature_size, distortion_type_len, distortion_level_len):
    """Lane-pad the hidden/class dims; fold b2 into a spare padded row of w2."""
    F = feature_size
    N = distortion_level_len * distortion_type_len
    F_pad = _round_up(F + 1, LANE)      # +1 guarantees a spare row for the folded bias
    N_pad = _round_up(N, LANE)
    w1 = jnp.zeros((F, F_pad), jnp.float32).at[:, :F].set(raw["w1"])
    gb = jnp.zeros((2, F_pad), jnp.float32)
    gb = gb.at[0, :F].set(raw["gamma"]).at[1, :F].set(raw["beta"])
    w2 = (jnp.zeros((F_pad, N_pad), jnp.float32)
          .at[:F, :N].set(raw["w2"])
          .at[F, :N].set(raw["b2"]))            # fc2 bias lives in row F
    return {"w1": w1, "gb": gb, "w2": w2,
            "F": F, "F_pad": F_pad, "N": N, "N_pad": N_pad,
            "L": distortion_level_len, "T": distortion_type_len}


def multi_classification_level_forward(x, params, *, train=False, seed=0):
    """x: (B, feature_size) f32 -> (B, distortion_level_len, distortion_type_len)."""
    B, F = x.shape
    assert F == params["F"]
    F_pad, N_pad = params["F_pad"], params["N_pad"]
    N, L, T = params["N"], params["L"], params["T"]

    x = x.astype(jnp.float32)
    Bp = _round_up(B, SUBLANE)
    if Bp != B:   # keep stores full-sublane; BN divides by the true B (padded rows are 0)
        x = jnp.zeros((Bp, F), jnp.float32).at[:B].set(x)

    full = lambda a: pl.BlockSpec(a.shape, lambda: (0,) * a.ndim)
    vmem_args = (x, params["w1"], params["gb"], params["w2"])
    out_shape = jax.ShapeDtypeStruct((Bp, N_pad), jnp.float32)
    out_spec = pl.BlockSpec((Bp, N_pad), lambda: (0, 0))

    if train:
        kernel = functools.partial(_train_kernel, batch=B, feature=F)
        seed_arr = jnp.array([seed], dtype=jnp.int32)
        out = pl.pallas_call(
            kernel,
            out_shape=out_shape,
            in_specs=[pl.BlockSpec(memory_space=pltpu.MemorySpace.SMEM)]
                     + [full(a) for a in vmem_args],
            out_specs=out_spec,
        )(seed_arr, *vmem_args)
    else:
        kernel = functools.partial(_eval_kernel, batch=B, feature=F)
        out = pl.pallas_call(
            kernel,
            out_shape=out_shape,
            in_specs=[full(a) for a in vmem_args],
            out_specs=out_spec,
        )(*vmem_args)

    return out[:B, :N].reshape(B, L, T)


if __name__ == "__main__":
    feature_size = 32
    distortion_type_len = 4
    distortion_level_len = 5
    patch_num = 8            # unused in forward (matches the PyTorch module)
    batch = 8

    key = jax.random.PRNGKey(0)
    kx, kp = jax.random.split(key)
    x = jax.random.normal(kx, (batch, feature_size), jnp.float32)
    raw = init_params(kp, feature_size, distortion_type_len, distortion_level_len)
    params = pack_params(raw, feature_size, distortion_type_len, distortion_level_len)

    # ---- eval-mode dropout (identity): reference check ----
    out = jax.block_until_ready(
        multi_classification_level_forward(x, params, train=False))
    assert out.shape == (batch, distortion_level_len, distortion_type_len)

    # pure-JAX reference at the SAME default matmul precision as the kernel
    # (includes the fc1 bias; it cancels exactly through training-mode BN).
    h = jnp.dot(x, raw["w1"]) + raw["b1"]
    mean = jnp.mean(h, axis=0, keepdims=True)
    var = jnp.mean((h - mean) ** 2, axis=0, keepdims=True)
    h = (h - mean) / jnp.sqrt(var + BN_EPS) * raw["gamma"] + raw["beta"]
    h = jnp.maximum(h, 0.0)
    logits = jnp.dot(h, raw["w2"]) + raw["b2"]
    ref = logits.reshape(batch, distortion_level_len, distortion_type_len)
    assert jnp.allclose(out, ref, atol=5e-3, rtol=5e-3), \
        float(jnp.max(jnp.abs(out - ref)))

    # ---- training-mode dropout: every element is either 0 or 2x the eval value ----
    out_tr = jax.block_until_ready(
        multi_classification_level_forward(x, params, train=True, seed=1234))
    dropped = jnp.abs(out_tr) < 1e-6
    kept_ok = jnp.abs(out_tr - 2.0 * out) < 5e-3
    assert bool(jnp.all(dropped | kept_ok))
    assert 0 < int(jnp.sum(dropped)) < out_tr.size

    print("KERNEL_OK")
</pallas_src>

<mosaic_0001>
module attributes {stable_mosaic.version = 11 : i64} {
  func.func @_eval_kernel(%arg0: memref<8x32xf32, #tpu.memory_space<vmem>>, %arg1: memref<32x128xf32, #tpu.memory_space<vmem>>, %arg2: memref<2x128xf32, #tpu.memory_space<vmem>>, %arg3: memref<128x128xf32, #tpu.memory_space<vmem>>, %arg4: memref<8x128xf32, #tpu.memory_space<vmem>>) attributes {dimension_semantics = [], scalar_prefetch = 0 : i64, scratch_operands = 0 : i64, tpu.core_type = #tpu.core_type<tc>} {
    %c0 = arith.constant 0 : index
    %c0_0 = arith.constant 0 : index
    %0 = vector.load %arg0[%c0, %c0_0] : memref<8x32xf32, #tpu.memory_space<vmem>>, vector<8x32xf32>
    %c0_1 = arith.constant 0 : index
    %c0_2 = arith.constant 0 : index
    %1 = vector.load %arg1[%c0_1, %c0_2] : memref<32x128xf32, #tpu.memory_space<vmem>>, vector<32x128xf32>
    %cst = arith.constant dense<0.000000e+00> : vector<8x128xf32>
    %2 = tpu.matmul %0, %1, %cst {dimension_numbers = #tpu.dot_dimension_numbers<[1], [0], [0], [1], [0, 0, 1, 1], [], []>} : vector<8x32xf32>, vector<32x128xf32>, vector<8x128xf32> -> vector<8x128xf32>
    %cst_3 = arith.constant dense<0.000000e+00> : vector<128xf32>
    %3 = vector.multi_reduction <add>, %2, %cst_3 [0] : vector<8x128xf32> to vector<128xf32>
    %4 = vector.shape_cast %3 : vector<128xf32> to vector<1x128xf32>
    %5 = arith.mulf %2, %2 : vector<8x128xf32>
    %cst_4 = arith.constant dense<0.000000e+00> : vector<128xf32>
    %6 = vector.multi_reduction <add>, %5, %cst_4 [0] : vector<8x128xf32> to vector<128xf32>
    %7 = vector.shape_cast %6 : vector<128xf32> to vector<1x128xf32>
    %cst_5 = arith.constant 1.250000e-01 : f32
    %8 = vector.broadcast %cst_5 : f32 to vector<1x128xf32>
    %9 = arith.mulf %4, %8 : vector<1x128xf32>
    %cst_6 = arith.constant 1.250000e-01 : f32
    %10 = vector.broadcast %cst_6 : f32 to vector<1x128xf32>
    %11 = arith.mulf %7, %10 : vector<1x128xf32>
    %12 = arith.mulf %9, %9 : vector<1x128xf32>
    %13 = arith.subf %11, %12 : vector<1x128xf32>
    %cst_7 = arith.constant 0.000000e+00 : f32
    %14 = vector.broadcast %cst_7 : f32 to vector<1x128xf32>
    %15 = arith.maximumf %13, %14 : vector<1x128xf32>
    %c0_8 = arith.constant 0 : index
    %c0_9 = arith.constant 0 : index
    %16 = vector.load %arg2[%c0_8, %c0_9] : memref<2x128xf32, #tpu.memory_space<vmem>>, vector<2x128xf32>
    %17 = vector.extract_strided_slice %16 {offsets = [0, 0], sizes = [1, 128], strides = [1, 1]} : vector<2x128xf32> to vector<1x128xf32>
    %cst_10 = arith.constant 9.99999974E-6 : f32
    %18 = vector.broadcast %cst_10 : f32 to vector<1x128xf32>
    %19 = arith.addf %15, %18 : vector<1x128xf32>
    %20 = math.rsqrt %19 : vector<1x128xf32>
    %21 = arith.mulf %17, %20 : vector<1x128xf32>
    %22 = vector.extract_strided_slice %16 {offsets = [1, 0], sizes = [1, 128], strides = [1, 1]} : vector<2x128xf32> to vector<1x128xf32>
    %23 = arith.mulf %9, %21 : vector<1x128xf32>
    %24 = arith.subf %22, %23 : vector<1x128xf32>
    %25 = vector.broadcast %21 : vector<1x128xf32> to vector<8x128xf32>
    %26 = arith.mulf %2, %25 : vector<8x128xf32>
    %27 = vector.broadcast %24 : vector<1x128xf32> to vector<8x128xf32>
    %28 = arith.addf %26, %27 : vector<8x128xf32>
    %cst_11 = arith.constant 0.000000e+00 : f32
    %29 = vector.broadcast %cst_11 : f32 to vector<8x128xf32>
    %30 = arith.maximumf %28, %29 : vector<8x128xf32>
    %31 = tpu.iota {dimensions = array<i32: 1>} : vector<8x128xi32>
    %c32_i32 = arith.constant 32 : i32
    %32 = vector.broadcast %c32_i32 : i32 to vector<8x128xi32>
    %33 = arith.cmpi eq, %31, %32 : vector<8x128xi32>
    %cst_12 = arith.constant 1.000000e+00 : f32
    %34 = vector.broadcast %cst_12 : f32 to vector<8x128xf32>
    %35 = arith.select %33, %34, %30 : vector<8x128xi1>, vector<8x128xf32>
    %c0_13 = arith.constant 0 : index
    %c0_14 = arith.constant 0 : index
    %36 = vector.load %arg3[%c0_13, %c0_14] : memref<128x128xf32, #tpu.memory_space<vmem>>, vector<128x128xf32>
    %cst_15 = arith.constant dense<0.000000e+00> : vector<8x128xf32>
    %37 = tpu.matmul %35, %36, %cst_15 {dimension_numbers = #tpu.dot_dimension_numbers<[1], [0], [0], [1], [0, 0, 1, 1], [], []>} : vector<8x128xf32>, vector<128x128xf32>, vector<8x128xf32> -> vector<8x128xf32>
    %c0_16 = arith.constant 0 : index
    %c0_17 = arith.constant 0 : index
    %38 = vector.load %arg4[%c0_16, %c0_17] : memref<8x128xf32, #tpu.memory_space<vmem>>, vector<8x128xf32>
    tpu.vector_store %arg4[%c0_16, %c0_17], %37 {strides = array<i32>} : memref<8x128xf32, #tpu.memory_space<vmem>>, vector<8x128xf32>,
    return
  }
}

</mosaic_0001>

<bundles_post_ra>
// kernel: tpu_custom_call.1
= control target key start
LH: loop header
LB: loop body
LE: loop exit
PB: predicated region body
PF: predicated region fallthrough
CT: control target
= control target key end

     0   :  { %9 = vsyncpa [#allocation3], 0  ;;  %s516_s0 = inlined_call_operand.hbm [shape: f32[8,32], index: 0, kind: input, shape index: {}]   ;;  %s517_s1 = inlined_call_operand.hbm [shape: f32[32,128], index: 1, kind: input, shape index: {}]   ;;  %s518_s2 = inlined_call_operand.vmem [shape: f32[2,128], index: 2, kind: input, shape index: {}]   ;;  %s519_s3 = inlined_call_operand.hbm [shape: f32[128,128], index: 3, kind: input, shape index: {}]   ;;  %s520_s4 = inlined_call_operand.hbm [shape: f32[8,128], index: 4, kind: output, shape index: {}]  }
   0x1   :  { %10 = vsyncpa [#allocation6], 0 }
   0x2   :  { %11 = vsyncpa [#allocation4], 0  ;;  %s446_s15 = smov [#allocation5]  }
   0x3   :  { %s27_s16 = sshll.u32 %s446_s15, 4  ;;  %s28_s16 = int_to_ptr.vmem [resolvable:$true] %s27_s16 }
   0x4   :  { %s368_s17 = scalar_lea.vmem %s28_s16, 512  ;;  %p373_p1 = scmp.lt.s32.totalorder %s28_s16, %s28_s16 }
   0x5   :  { %p369_p0 = scmp.ne.s32.totalorder %s28_s16, %s368_s17  ;;  %p374_p2 = scmp.lt.s32.totalorder %s368_s17, %s368_s17 }
   0x7   :  { %p375_p3 = por %p374_p2, %p373_p1 }
   0x9   :  { %p376_p4 = pnand %p375_p3, %p369_p0 }
   0xb   :  { %379 = shalt.err (!%p376_p4)
}
   0xc   :  { %s447_s18 = smov 128   ;;  %s448_s19 = smov 8  }
   0xd   :  { %33 = dma.hbm_to_vmem [thread:$0]  %s517_s1, 512, %s28_s16, [#allocation6], %s447_s18, %s447_s18, %s448_s19  }
   0xe   :  { %s449_s22 = smov [#allocation2]   ;;  %s450_s24 = smov [#allocation7]  }
   0xf   :  { %s18_s23 = sshll.u32 %s449_s22, 4  ;;  %s41_s25 = sshll.u32 %s450_s24, 4  ;;  %s19_s23 = int_to_ptr.vmem [resolvable:$true] %s18_s23  ;;  %s42_s25 = int_to_ptr.vmem [resolvable:$true] %s41_s25 }
  0x10   :  { %s388_s26 = scalar_lea.vmem %s19_s23, 128  ;;  %p393_p6 = scmp.lt.s32.totalorder %s19_s23, %s19_s23 }
  0x11   :  { %p389_p5 = scmp.ne.s32.totalorder %s19_s23, %s388_s26  ;;  %p394_p7 = scmp.lt.s32.totalorder %s388_s26, %s388_s26 }
  0x13   :  { %p395_p8 = por %p394_p7, %p393_p6 }
  0x15   :  { %p396_p9 = pnand %p395_p8, %p389_p5 }
  0x17   :  { %399 = shalt.err (!%p396_p9)
}
  0x18   :  { %21 = dma.hbm_to_vmem [thread:$0]  %s516_s0, 128, %s19_s23, [#allocation3]  }
  0x19   :  { %s408_s29 = scalar_lea.vmem %s42_s25, 2048  ;;  %p413_p11 = scmp.lt.s32.totalorder %s42_s25, %s42_s25 }
  0x1a   :  { %p409_p10 = scmp.ne.s32.totalorder %s42_s25, %s408_s29  ;;  %p414_p12 = scmp.lt.s32.totalorder %s408_s29, %s408_s29 }
  0x1c   :  { %p415_p13 = por %p414_p12, %p413_p11 }
  0x1e   :  { %p416_p0 = pnand %p415_p13, %p409_p10 }
  0x20   :  { %419 = shalt.err (!%p416_p0)
}
  0x21   :  { %47 = dma.hbm_to_vmem [thread:$0]  %s519_s3, 2048, %s42_s25, [#allocation6], %s447_s18, %s447_s18, %s448_s19  }
  0x22   :  { %440 = dma.done.wait [#allocation3], 128  }
  0x23   :  { %441 = vsyncadd [#allocation3], 4294967168 }
  0x24   :  { %442 = dma.done.wait [#allocation6], 2560  }
  0x25   :  { %443 = vsyncadd [#allocation6], 4294964736  ;;  %v451_v0 = vmov 0.0   ;;  %vm452_vm0 = vmmov 0   ;;  %v61_v1 = vld [vmem:[#allocation5 + $0x18] sm:$0xff]  ;;  %v60_v2 = vld [vmem:[#allocation5 + $0x10] sm:$0xff]  ;;  %v163_v43 = vlaneseq }
  0x26   :  { %304 = vmatprep.subr.mxu0 %v451_v0  ;;  %312 = vmatprep.mubr.msk.f32.mxu0 %vm452_vm0, %v451_v0  ;;  %v59_v3 = vld [vmem:[#allocation5 + $0x8] sm:$0xff]  ;;  %v58_v4 = vld [vmem:[#allocation5] sm:$0xff]  ;;  %v57_v5 = vld [vmem:[#allocation2] sm:$0xff]  ;;  %vm62_vm1 = vcmask 261120   ;;  %s453_s5 = smov [#allocation8]  }
  0x27   :  { %315 = vmatprep.subr.mxu1 %v451_v0  ;;  %347 = vmatprep.mubr.msk.f32.mxu1 %vm452_vm0, %v451_v0  ;;  %v193_v6 = vld [vmem:[#allocation7 + $0x78] sm:$0xff]  ;;  %v192_v7 = vld [vmem:[#allocation7 + $0x70] sm:$0xff]  ;;  %v191_v8 = vld [vmem:[#allocation7 + $0x68] sm:$0xff]  ;;  %v164_v44 = vshrl.u32 %v163_v43, 7  ;;  %v175_v54 = vand.u32 127, %v163_v43  ;;  %s271_s6 = sshll.u32 %s453_s5, 4  ;;  %s272_s6 = int_to_ptr.vmem [resolvable:$true] %s271_s6 }
  0x28   :  { %305 = vmatpush3.msra.mxu0 %v61_v1  ;;  %316 = vmatpush3.msra.mxu1 %v193_v6  ;;  %v190_v9 = vld [vmem:[#allocation7 + $0x60] sm:$0xff]  ;;  %v189_v10 = vld [vmem:[#allocation7 + $0x58] sm:$0xff]  ;;  %v188_v11 = vld [vmem:[#allocation7 + $0x50] sm:$0xff]  ;;  %p425_p2 = scmp.lt.s32.totalorder %s272_s6, %s272_s6 }
  0x29   :  { %306 = vmatprep.subr.mxu0 %v451_v0  ;;  %317 = vmatprep.subr.mxu1 %v451_v0  ;;  %v187_v12 = vld [vmem:[#allocation7 + $0x48] sm:$0xff]  ;;  %v186_v13 = vld [vmem:[#allocation7 + $0x40] sm:$0xff]  ;;  %v185_v14 = vld [vmem:[#allocation7 + $0x38] sm:$0xff]  ;;  %v165_v48 = vsub.s32 0, %v164_v44  ;;  %v170_v52 = vsub.s32 1, %v164_v44  ;;  %vm176_vm2 = vcmp.eq.s32.totalorder %v175_v54, 32 }
  0x2a   :  { %307 = vmatpush3.msra.mxu0 %v60_v2  ;;  %318 = vmatpush3.msra.mxu1 %v192_v7  ;;  %v184_v15 = vld [vmem:[#allocation7 + $0x30] sm:$0xff]  ;;  %v183_v16 = vld [vmem:[#allocation7 + $0x28] sm:$0xff]  ;;  %v182_v17 = vld [vmem:[#allocation7 + $0x20] sm:$0xff] }
  0x2b   :  { %308 = vmatprep.subr.mxu0 %v451_v0  ;;  %319 = vmatprep.subr.mxu1 %v451_v0  ;;  %v181_v18 = vld [vmem:[#allocation7 + $0x18] sm:$0xff]  ;;  %v180_v19 = vld [vmem:[#allocation7 + $0x10] sm:$0xff]  ;;  %v179_v20 = vld [vmem:[#allocation7 + $0x8] sm:$0xff] }
  0x2c   :  { %309 = vmatpush3.msra.mxu0 %v59_v3  ;;  %320 = vmatpush3.msra.mxu1 %v191_v8  ;;  %v178_v21 = vld [vmem:[#allocation7] sm:$0xff]  ;;  %v154_v45 = vld [vmem:[%s518_s2] sm:$0x3]  ;;  %s420_s2 = scalar_lea.vmem %s272_s6, 128 }
  0x2d   :  { %310 = vmatprep.subr.mxu0 %v451_v0  ;;  %321 = vmatprep.subr.mxu1 %v451_v0  ;;  %p421_p1 = scmp.ne.s32.totalorder %s272_s6, %s420_s2  ;;  %p426_p3 = scmp.lt.s32.totalorder %s420_s2, %s420_s2 }
  0x2e   :  { %311 = vmatpush3.msra.mxu0 %v58_v4  ;;  %322 = vmatpush3.msra.mxu1 %v190_v9 }
  0x2f   :  { %313 = vmatmul.mubr.msk.f32.vlgmr.msra.gmra.mxu0 %vm62_vm1, %v57_v5  ;;  %323 = vmatprep.subr.mxu1 %v451_v0  ;;  %p427_p4 = por %p426_p3, %p425_p2 }
  0x30   :  { %324 = vmatpush3.msra.mxu1 %v189_v10 }
  0x31   :  { %325 = vmatprep.subr.mxu1 %v451_v0  ;;  %p428_p5 = pnand %p427_p4, %p421_p1 }
  0x32   :  { %326 = vmatpush3.msra.mxu1 %v188_v11 }
  0x33   :  { %327 = vmatprep.subr.mxu1 %v451_v0 }
  0x34   :  { %328 = vmatpush3.msra.mxu1 %v187_v12 }
  0x35   :  { %329 = vmatprep.subr.mxu1 %v451_v0 }
  0x36   :  { %330 = vmatpush3.msra.mxu1 %v186_v13 }
  0x37   :  { %331 = vmatprep.subr.mxu1 %v451_v0 }
  0x38   :  { %332 = vmatpush3.msra.mxu1 %v185_v14 }
  0x39   :  { %333 = vmatprep.subr.mxu1 %v451_v0 }
  0x3a   :  { %334 = vmatpush3.msra.mxu1 %v184_v15 }
  0x3b   :  { %335 = vmatprep.subr.mxu1 %v451_v0 }
  0x3c   :  { %336 = vmatpush3.msra.mxu1 %v183_v16 }
  0x3d   :  { %337 = vmatprep.subr.mxu1 %v451_v0 }
  0x3e   :  { %338 = vmatpush3.msra.mxu1 %v182_v17 }
  0x3f   :  { %339 = vmatprep.subr.mxu1 %v451_v0 }
  0x40   :  { %340 = vmatpush3.msra.mxu1 %v181_v18 }
  0x41   :  { %341 = vmatprep.subr.mxu1 %v451_v0 }
  0x42   :  { %342 = vmatpush3.msra.mxu1 %v180_v19 }
  0x43   :  { %343 = vmatprep.subr.mxu1 %v451_v0 }
  0x44   :  { %344 = vmatpush3.msra.mxu1 %v179_v20 }
  0x45   :  { %345 = vmatprep.subr.mxu1 %v451_v0 }
  0x46   :  { %346 = vmatpush3.msra.mxu1 %v178_v21 }
  0xef   :  { %v132_v22 = vpop.f32.mrf.mxu0 }
  0xf0   :  { %v136_v23 = vrot.slane %v132_v22, 4  ;;  %v142_v24 = vmul.f32 %v132_v22, %v132_v22 }
  0xf1   :  { %v314_v25 = vpop.f32.mrf.mxu0 }
  0xf2   :  { %v137_v26 = vadd.f32 %v136_v23, %v132_v22  ;;  %v143_v27 = vrot.slane %v142_v24, 4 }
  0xf4   :  { %v138_v28 = vrot.slane %v137_v26, 2  ;;  %v144_v29 = vadd.f32 %v143_v27, %v142_v24 }
  0xf6   :  { %v139_v30 = vadd.f32 %v138_v28, %v137_v26  ;;  %v145_v31 = vrot.slane %v144_v29, 2 }
  0xf8   :  { %v140_v32 = vrot.slane %v139_v30, 1  ;;  %v146_v33 = vadd.f32 %v145_v31, %v144_v29 }
  0xfa   :  { %v141_v34 = vadd.f32 %v140_v32, %v139_v30  ;;  %v147_v35 = vrot.slane %v146_v33, 1 }
  0xfc   :  { %v148_v36 = vadd.f32 %v147_v35, %v146_v33  ;;  %v149_v37 = vmul.f32 0.125, %v141_v34 }
  0xfe   :  { %v150_v38 = vmul.f32 0.125, %v148_v36  ;;  %v151_v39 = vmul.f32 %v149_v37, %v149_v37 }
 0x100   :  { %v152_v40 = vsub.f32 %v150_v38, %v151_v39 }
 0x102   :  { %v153_v41 = vmax.f32 %v152_v40, 0.0 }
 0x104   :  { %v155_v42 = vadd.f32 1e-05, %v153_v41 }
 0x106   :  { %358 = vrsqrt.f32 %v155_v42 }
 0x113   :  { %v359_v46 = vpop.eup %358 }
 0x114   :  { %v157_v47 = vmul.f32 %v359_v46, %v154_v45 }
 0x116   :  { %v158_v49 = vmul.f32 %v157_v47, %v149_v37  ;;  %v166_v51 = vrot.slane %v157_v47, %v165_v48 }
 0x118   :  { %v160_v50 = vrot.slane %v158_v49, 7  ;;  %v167_v55 = vmul.f32 %v166_v51, %v132_v22 }
 0x11a   :  { %v162_v53 = vsub.f32 %v154_v45, %v160_v50 }
 0x11c   :  { %v171_v56 = vrot.slane %v162_v53, %v170_v52 }
 0x11e   :  { %v172_v57 = vadd.f32 %v171_v56, %v167_v55 }
 0x120   :  { %v173_v58 = vmax.f32 %v172_v57, 0.0 }
 0x122   :  { %v177_v59 = vsel %vm176_vm2, 1.0, %v173_v58 }
 0x123   :  { %348 = vmatmul.mubr.f32.vlgmr.msra.gmra.mxu1 %v177_v59 }
 0x1e3   :  { %v260_v60 = vpop.f32.mrf.mxu1 }
 0x1e4   :  { %264 = vst [vmem:[#allocation8] sm:$0xff] %v260_v60 }
 0x1e5   :  { %v349_v61 = vpop.f32.mrf.mxu1 }
 0x1e6   :  { %431 = shalt.err (!%p428_p5)
}
 0x1e7   :  { %274 = dma.vmem_to_hbm [thread:$0]  %s272_s6, 128, %s520_s4, [#allocation4]  }
 0x1e8   :  { %444 = dma.done.wait [#allocation4], 128  }
 0x1e9   :  { %445 = vsyncadd [#allocation4], 4294967168 }
 0x1ea   :  { %278 = vsyncpa [#allocation3], 1 }
 0x1eb   :  { %279 = vsyncpa [#allocation6], 1 }
 0x1ec   :  { %280 = vsyncpa [#allocation4], 1 }

</bundles_post_ra>
